<compile_context>
chip_gen: v5e
topology: v5e:2x2
jax: 0.10.0
libtpu: 0.0.40
codegen_flags: <defaults>
</compile_context>

<pallas_src>
import math
from functools import lru_cache

import numpy as np
from numpy import pi, sin, cos, tan, arcsin, arctan

import jax
import jax.numpy as jnp
from jax.experimental import pallas as pl
from jax.experimental.pallas import tpu as pltpu


# ----------------------------------------------------------------------------
# Static spherical sampling pattern (pure numpy; identical to the PyTorch ref)
# ----------------------------------------------------------------------------
@lru_cache(None)
def get_relative_positions(w, h):
    d_phi = pi / h
    d_theta = 2 * pi / w
    return np.array(
        [[[-tan(d_theta), 1 / cos(d_theta) * tan(d_phi)],
          [0, tan(d_phi)],
          [tan(d_theta), 1 / cos(d_theta) * tan(d_phi)]],
         [[-tan(d_theta), 0],
          [0.5, 0.5],
          [tan(d_theta), 0]],
         [[-tan(d_theta), -1 / cos(d_theta) * tan(d_phi)],
          [0, -tan(d_phi)],
          [tan(d_theta), -1 / cos(d_theta) * tan(d_phi)]]])


@lru_cache(None)
def get_absolute_positions(h, w, center_x, center_y):
    relative_positions = get_relative_positions(w, h)
    x = relative_positions[..., 0]
    y = relative_positions[..., 1]
    rho = np.sqrt(x ** 2 + y ** 2)
    v = arctan(rho)
    offset = 0.1
    center_theta = (center_x + offset) * 2 * pi / w - pi
    center_phi = pi / 2 - (center_y + offset) * pi / h
    phi = arcsin(cos(v) * sin(center_phi) + y * sin(v) * cos(center_phi) / rho)
    theta = center_theta + arctan(
        x * sin(v) / (rho * cos(center_phi) * cos(v) - y * sin(center_phi) * sin(v)))
    img_x = ((theta + pi) * w / pi / 2 - offset) % w
    img_y = (pi / 2 - phi) * h / pi - offset
    absolute_positions = np.stack([img_x, img_y], axis=-1)
    absolute_positions[1, 1] = (center_x, center_y)
    return absolute_positions


@lru_cache(None)
def kernel_sampling_pattern(h, w, stride):
    pattern = np.array([[get_absolute_positions(h, w, x, y)
                         for y in range(0, h, stride)]
                        for x in range(0, w, stride)])
    pattern[..., 0] = pattern[..., 0] * 2 / w - 1
    pattern[..., 1] = pattern[..., 1] * 2 / h - 1
    pattern = pattern.transpose(0, 2, 1, 3, 4)
    s = pattern.shape
    pattern = pattern.reshape(1, s[0] * s[1], s[2] * s[3], 2)
    return pattern.copy()


def _bilinear_coeffs(H, W, stride):
    """Unnormalize the sampling grid exactly like F.grid_sample
    (bilinear, padding_mode='zeros', align_corners=False)."""
    grid = np.asarray(kernel_sampling_pattern(H, W, stride), dtype=np.float32)[0]
    gx, gy = grid[..., 0], grid[..., 1]
    ix = ((gx + 1.0) * W - 1.0) / 2.0
    iy = ((gy + 1.0) * H - 1.0) / 2.0
    x0 = np.floor(ix).astype(np.int64)
    y0 = np.floor(iy).astype(np.int64)
    x1, y1 = x0 + 1, y0 + 1
    wx1, wy1 = ix - x0, iy - y0
    wx0, wy0 = 1.0 - wx1, 1.0 - wy1
    return grid.shape[0], grid.shape[1], (x0, x1, y0, y1, wx0, wx1, wy0, wy1)


# ----------------------------------------------------------------------------
# Sparse (4-tap) sampling tables:  indices + compact bilinear weights
# ----------------------------------------------------------------------------
def _round_up(x, m):
    return -(-x // m) * m


def _spatial_tile(P, C, tp_max=2048):
    """Lane tile (multiple of 128) and padded spatial extent Pp that it divides.
    Keeps the double-buffered gathered-tap block (4*C*9*tp f32 x 2) small."""
    per_lane = 4 * C * 9 * 4 * 2
    cap = max(128, (8 * 1024 * 1024 // per_lane) // 128 * 128)
    tp_max = min(tp_max, cap)
    Pp = _round_up(P, 128)
    tp = 128
    for cand in range(min(tp_max, Pp), 127, -128):
        if Pp % cand == 0:
            tp = cand
            break
    return tp, Pp


def build_tap_tables(H, W, stride, C, tp_max=2048):
    """Per-tap gather indices (channel-folded, rows ordered c*9+k) and compact
    bilinear weights, padded along the spatial axis to a lane multiple Pp."""
    Gh, Gw, (x0, x1, y0, y1, wx0, wx1, wy0, wy1) = _bilinear_coeffs(H, W, stride)
    Ph, Pw = Gh // 3, Gw // 3
    P = Ph * Pw
    tp, Pp = _spatial_tile(P, C, tp_max)

    gh = np.arange(Gh)[:, None]
    gw = np.arange(Gw)[None, :]
    k = (gh % 3) * 3 + (gw % 3)              # (Gh, Gw) kernel-tap index
    p = (gh // 3) * Pw + (gw // 3)           # (Gh, Gw) output-position index

    base_idx = np.zeros((4, 9, Pp), np.int64)
    wgt = np.zeros((4, 9, Pp), np.float32)
    taps = [(x0, y0, wx0 * wy0), (x1, y0, wx1 * wy0),
            (x0, y1, wx0 * wy1), (x1, y1, wx1 * wy1)]
    for t, (xs, ys, ws) in enumerate(taps):
        valid = (xs >= 0) & (xs < W) & (ys >= 0) & (ys < H)     # zeros padding
        src = np.clip(ys, 0, H - 1) * W + np.clip(xs, 0, W - 1)
        base_idx[t, k, p] = src
        wgt[t, k, p] = np.where(valid, ws, 0.0)

    # Channel-folded indices: gather straight from x.reshape(N, C*H*W) into
    # im2col row order c*9 + k  -> no wrapper-side transpose needed.
    idx = (np.arange(C, dtype=np.int64)[None, :, None, None] * (H * W)
           + base_idx[:, None, :, :]).reshape(4, C * 9, Pp).astype(np.int32)
    return idx, wgt, Ph, Pw, P, Pp, tp


# ----------------------------------------------------------------------------
# Fused Pallas kernel: bilinear tap FMA (VPU, f32) + conv matmul (MXU) + bias
# ----------------------------------------------------------------------------
_VMEM_LIMIT = 32 * 1024 * 1024   # safe on v5e / v6e / v7x (2 TCs share 64 MiB)


def _make_fused_kernel(C):
    def kernel(wgt_ref, g_ref, wconv_ref, bias_ref, o_ref):
        # wgt_ref  : (4, 9, tp)      f32  compact bilinear tap weights
        # g_ref    : (1, 4, C*9, tp) f32  gathered taps, rows ordered c*9+k
        # wconv_ref: (OC, C*9)       bf16 flattened conv weight
        # bias_ref : (OC, 1)         f32
        # o_ref    : (1, OC, tp)     f32
        acc = None
        for t in range(4):                                    # unrolled VPU FMA
            w_t = jnp.concatenate([wgt_ref[t]] * C, axis=0)   # (C*9, tp): row c*9+k -> wgt[t, k]
            contrib = g_ref[0, t] * w_t
            acc = contrib if acc is None else acc + contrib
        y = acc.astype(jnp.bfloat16)                          # im2col tile, in VMEM
        o_ref[0] = (jnp.dot(wconv_ref[...], y,
                            preferred_element_type=jnp.float32)
                    + bias_ref[...])
    return kernel


def fused_sample_conv(wgt, g, w_flat_bf16, bias_col, tp):
    N, T, CK, Pp = g.shape
    assert T == 4 and Pp % tp == 0 and CK % 9 == 0
    C = CK // 9
    OC = w_flat_bf16.shape[0]
    return pl.pallas_call(
        _make_fused_kernel(C),
        out_shape=jax.ShapeDtypeStruct((N, OC, Pp), jnp.float32),
        grid=(N, Pp // tp),
        in_specs=[
            pl.BlockSpec((4, 9, tp), lambda n, j: (0, 0, j)),
            pl.BlockSpec((1, 4, CK, tp), lambda n, j: (n, 0, 0, j)),
            pl.BlockSpec((OC, CK), lambda n, j: (0, 0)),
            pl.BlockSpec((OC, 1), lambda n, j: (0, 0)),
        ],
        out_specs=pl.BlockSpec((1, OC, tp), lambda n, j: (n, 0, j)),
        compiler_params=pltpu.CompilerParams(
            dimension_semantics=("parallel", "parallel"),
            vmem_limit_bytes=_VMEM_LIMIT),
    )(wgt, g, w_flat_bf16, bias_col)


# ----------------------------------------------------------------------------
# SphereConv module (JAX/Pallas)
# ----------------------------------------------------------------------------
class SphereConvPallas:
    TP_MAX = 2048   # lane (spatial) tile cap; amortizes per-step overhead

    def __init__(self, in_c, out_c, stride=1, key=jax.random.PRNGKey(0)):
        self.in_c, self.out_c, self.stride = in_c, out_c, stride
        # kaiming_uniform_(a=sqrt(5)) on (out_c, in_c, 3, 3):
        # bound = sqrt(6 / ((1 + a^2) * fan_in)) = 1 / sqrt(in_c * 9)
        bound = 1.0 / math.sqrt(in_c * 9)
        self.weight = jax.random.uniform(
            key, (out_c, in_c, 3, 3), minval=-bound, maxval=bound,
            dtype=jnp.float32)
        self.bias = jnp.zeros((out_c,), jnp.float32)
        # Static conv operands (only the conv matmul runs in bf16).
        self._w_flat = self.weight.reshape(out_c, in_c * 9).astype(jnp.bfloat16)
        self._bias_col = self.bias.reshape(out_c, 1)
        self._pattern_cache = {}

    def _pattern(self, H, W):
        key = (H, W)
        if key not in self._pattern_cache:
            idx, wgt, Ph, Pw, P, Pp, tp = build_tap_tables(
                H, W, self.stride, self.in_c, self.TP_MAX)
            self._pattern_cache[key] = (jnp.asarray(idx), jnp.asarray(wgt),
                                        Ph, Pw, P, Pp, tp)
        return self._pattern_cache[key]

    def __call__(self, x):
        # x: (N, C, H, W) float32 (NCHW, like PyTorch)
        N, C, H, W = x.shape
        assert C == self.in_c
        idx, wgt, Ph, Pw, P, Pp, tp = self._pattern(H, W)
        CK = C * 9

        # Sparse sampling: gather the 4 bilinear taps (static indices) in f32.
        # TODO(synk): move this gather inside the Pallas kernel (DMA gather)
        # so the taps never round-trip HBM.
        g = jnp.take(x.reshape(N, C * H * W), idx, axis=1)     # (N, 4, CK, Pp)

        # Fused: bilinear weighted sum (VPU, f32) + 3x3/stride-3 conv (MXU).
        out = fused_sample_conv(wgt, g, self._w_flat, self._bias_col, tp)
        if Pp != P:
            out = out[:, :, :P]
        # NOTE: output spatial order is (Ph, Pw) = (ceil(W/stride), ceil(H/stride)),
        # matching the PyTorch module's pattern construction.
        return out.reshape(N, self.out_c, Ph, Pw)


# ----------------------------------------------------------------------------
# Pure-JAX reference (independent gather + lax.conv, full f32) for validation
# ----------------------------------------------------------------------------
def reference_forward(x, weight, bias, stride):
    N, C, H, W = x.shape
    Gh, Gw, (x0, x1, y0, y1, wx0, wx1, wy0, wy1) = _bilinear_coeffs(H, W, stride)

    def gather(ys, xs):
        valid = ((xs >= 0) & (xs < W) & (ys >= 0) & (ys < H)).astype(np.float32)
        xs_c = np.clip(xs, 0, W - 1)
        ys_c = np.clip(ys, 0, H - 1)
        return x[:, :, ys_c, xs_c] * valid[None, None]

    samp = (gather(y0, x0) * (wx0 * wy0)[None, None]
            + gather(y0, x1) * (wx1 * wy0)[None, None]
            + gather(y1, x0) * (wx0 * wy1)[None, None]
            + gather(y1, x1) * (wx1 * wy1)[None, None])
    out = jax.lax.conv_general_dilated(
        samp, weight, window_strides=(3, 3), padding="VALID",
        dimension_numbers=("NCHW", "OIHW", "NCHW"),
        precision=jax.lax.Precision.HIGHEST)
    return out + bias[None, :, None, None]


if __name__ == "__main__":
    key = jax.random.PRNGKey(0)
    k_x, k_w = jax.random.split(key)

    N, C, H, W = 2, 4, 16, 16
    out_c, stride = 8, 1
    x = jax.random.normal(k_x, (N, C, H, W), dtype=jnp.float32)

    conv = SphereConvPallas(C, out_c, stride=stride, key=k_w)
    out = jax.block_until_ready(conv(x))

    ref = jax.block_until_ready(reference_forward(x, conv.weight, conv.bias, stride))
    assert out.shape == (N, out_c, W // stride, H // stride), out.shape
    np.testing.assert_allclose(np.asarray(out), np.asarray(ref),
                               rtol=1e-2, atol=1e-2)

    print("KERNEL_OK")
</pallas_src>

<mosaic_0001>
module attributes {stable_mosaic.version = 11 : i64} {
  func.func @kernel(%arg0: i32, %arg1: i32, %arg2: memref<4x9x256xf32, #tpu.memory_space<vmem>>, %arg3: memref<1x4x36x256xf32, #tpu.memory_space<vmem>>, %arg4: memref<8x36xbf16, #tpu.memory_space<vmem>>, %arg5: memref<8x1xf32, #tpu.memory_space<vmem>>, %arg6: memref<1x8x256xf32, #tpu.memory_space<vmem>>) attributes {dimension_semantics = [#tpu.dimension_semantics<parallel>, #tpu.dimension_semantics<parallel>], iteration_bounds = array<i64: 2, 1>, scalar_prefetch = 0 : i64, scratch_operands = 0 : i64, tpu.core_type = #tpu.core_type<tc>, window_params = [{transform_indices = @transform_0, window_bounds = array<i64: 4, 9, 256>}, {transform_indices = @transform_1, window_bounds = array<i64: 1, 4, 36, 256>}, {pipeline_mode = #tpu.pipeline_mode<synchronous>, transform_indices = @transform_2, window_bounds = array<i64: 8, 36>}, {pipeline_mode = #tpu.pipeline_mode<synchronous>, transform_indices = @transform_3, window_bounds = array<i64: 8, 1>}, {transform_indices = @transform_4, window_bounds = array<i64: 1, 8, 256>}]} {
    %c0 = arith.constant 0 : index
    %c0_0 = arith.constant 0 : index
    %c0_1 = arith.constant 0 : index
    %0 = vector.load %arg2[%c0, %c0_0, %c0_1] : memref<4x9x256xf32, #tpu.memory_space<vmem>>, vector<1x9x256xf32>
    %1 = vector.shape_cast %0 : vector<1x9x256xf32> to vector<9x256xf32>
    %2 = tpu.concatenate %1, %1, %1, %1 in 0 : vector<9x256xf32>, vector<9x256xf32>, vector<9x256xf32>, vector<9x256xf32> -> vector<36x256xf32>
    %c0_2 = arith.constant 0 : index
    %c0_3 = arith.constant 0 : index
    %c0_4 = arith.constant 0 : index
    %c0_5 = arith.constant 0 : index
    %3 = vector.load %arg3[%c0_2, %c0_3, %c0_4, %c0_5] : memref<1x4x36x256xf32, #tpu.memory_space<vmem>>, vector<1x1x36x256xf32>
    %4 = vector.shape_cast %3 : vector<1x1x36x256xf32> to vector<36x256xf32>
    %5 = arith.mulf %4, %2 : vector<36x256xf32>
    %c1 = arith.constant 1 : index
    %c0_6 = arith.constant 0 : index
    %c0_7 = arith.constant 0 : index
    %6 = vector.load %arg2[%c1, %c0_6, %c0_7] : memref<4x9x256xf32, #tpu.memory_space<vmem>>, vector<1x9x256xf32>
    %7 = vector.shape_cast %6 : vector<1x9x256xf32> to vector<9x256xf32>
    %8 = tpu.concatenate %7, %7, %7, %7 in 0 : vector<9x256xf32>, vector<9x256xf32>, vector<9x256xf32>, vector<9x256xf32> -> vector<36x256xf32>
    %c0_8 = arith.constant 0 : index
    %c1_9 = arith.constant 1 : index
    %c0_10 = arith.constant 0 : index
    %c0_11 = arith.constant 0 : index
    %9 = vector.load %arg3[%c0_8, %c1_9, %c0_10, %c0_11] : memref<1x4x36x256xf32, #tpu.memory_space<vmem>>, vector<1x1x36x256xf32>
    %10 = vector.shape_cast %9 : vector<1x1x36x256xf32> to vector<36x256xf32>
    %11 = arith.mulf %10, %8 : vector<36x256xf32>
    %12 = arith.addf %5, %11 : vector<36x256xf32>
    %c2 = arith.constant 2 : index
    %c0_12 = arith.constant 0 : index
    %c0_13 = arith.constant 0 : index
    %13 = vector.load %arg2[%c2, %c0_12, %c0_13] : memref<4x9x256xf32, #tpu.memory_space<vmem>>, vector<1x9x256xf32>
    %14 = vector.shape_cast %13 : vector<1x9x256xf32> to vector<9x256xf32>
    %15 = tpu.concatenate %14, %14, %14, %14 in 0 : vector<9x256xf32>, vector<9x256xf32>, vector<9x256xf32>, vector<9x256xf32> -> vector<36x256xf32>
    %c0_14 = arith.constant 0 : index
    %c2_15 = arith.constant 2 : index
    %c0_16 = arith.constant 0 : index
    %c0_17 = arith.constant 0 : index
    %16 = vector.load %arg3[%c0_14, %c2_15, %c0_16, %c0_17] : memref<1x4x36x256xf32, #tpu.memory_space<vmem>>, vector<1x1x36x256xf32>
    %17 = vector.shape_cast %16 : vector<1x1x36x256xf32> to vector<36x256xf32>
    %18 = arith.mulf %17, %15 : vector<36x256xf32>
    %19 = arith.addf %12, %18 : vector<36x256xf32>
    %c3 = arith.constant 3 : index
    %c0_18 = arith.constant 0 : index
    %c0_19 = arith.constant 0 : index
    %20 = vector.load %arg2[%c3, %c0_18, %c0_19] : memref<4x9x256xf32, #tpu.memory_space<vmem>>, vector<1x9x256xf32>
    %21 = vector.shape_cast %20 : vector<1x9x256xf32> to vector<9x256xf32>
    %22 = tpu.concatenate %21, %21, %21, %21 in 0 : vector<9x256xf32>, vector<9x256xf32>, vector<9x256xf32>, vector<9x256xf32> -> vector<36x256xf32>
    %c0_20 = arith.constant 0 : index
    %c3_21 = arith.constant 3 : index
    %c0_22 = arith.constant 0 : index
    %c0_23 = arith.constant 0 : index
    %23 = vector.load %arg3[%c0_20, %c3_21, %c0_22, %c0_23] : memref<1x4x36x256xf32, #tpu.memory_space<vmem>>, vector<1x1x36x256xf32>
    %24 = vector.shape_cast %23 : vector<1x1x36x256xf32> to vector<36x256xf32>
    %25 = arith.mulf %24, %22 : vector<36x256xf32>
    %26 = arith.addf %19, %25 : vector<36x256xf32>
    %27 = arith.truncf %26 : vector<36x256xf32> to vector<36x256xbf16>
    %c0_24 = arith.constant 0 : index
    %c0_25 = arith.constant 0 : index
    %28 = vector.load %arg4[%c0_24, %c0_25] : memref<8x36xbf16, #tpu.memory_space<vmem>>, vector<8x36xbf16>
    %cst = arith.constant dense<0.000000e+00> : vector<8x256xf32>
    %29 = tpu.matmul %28, %27, %cst {dimension_numbers = #tpu.dot_dimension_numbers<[1], [0], [0], [1], [0, 0, 1, 1], [], []>} : vector<8x36xbf16>, vector<36x256xbf16>, vector<8x256xf32> -> vector<8x256xf32>
    %c0_26 = arith.constant 0 : index
    %c0_27 = arith.constant 0 : index
    %30 = vector.load %arg5[%c0_26, %c0_27] : memref<8x1xf32, #tpu.memory_space<vmem>>, vector<8x1xf32>
    %31 = vector.broadcast %30 : vector<8x1xf32> to vector<8x256xf32>
    %32 = arith.addf %29, %31 : vector<8x256xf32>
    %c0_28 = arith.constant 0 : index
    %c0_29 = arith.constant 0 : index
    %c0_30 = arith.constant 0 : index
    %33 = vector.load %arg6[%c0_28, %c0_29, %c0_30] : memref<1x8x256xf32, #tpu.memory_space<vmem>>, vector<1x8x256xf32>
    %34 = vector.shape_cast %33 : vector<1x8x256xf32> to vector<8x256xf32>
    %35 = vector.shape_cast %32 : vector<8x256xf32> to vector<1x8x256xf32>
    tpu.vector_store %arg6[%c0_28, %c0_29, %c0_30], %35 {strides = array<i32>} : memref<1x8x256xf32, #tpu.memory_space<vmem>>, vector<1x8x256xf32>,
    return
  }
  func.func @transform_0(%arg0: i32, %arg1: i32) -> (i32, i32, i32) {
    %c0_i32 = arith.constant 0 : i32
    %c0_i32_0 = arith.constant 0 : i32
    %c0_i32_1 = arith.constant 0 : i32
    return %c0_i32, %c0_i32_0, %arg1 : i32, i32, i32
  }
  func.func @transform_1(%arg0: i32, %arg1: i32) -> (i32, i32, i32, i32) {
    %c0_i32 = arith.constant 0 : i32
    %c0_i32_0 = arith.constant 0 : i32
    %c0_i32_1 = arith.constant 0 : i32
    return %arg0, %c0_i32, %c0_i32_0, %arg1 : i32, i32, i32, i32
  }
  func.func @transform_2(%arg0: i32, %arg1: i32) -> (i32, i32) {
    %c0_i32 = arith.constant 0 : i32
    %c0_i32_0 = arith.constant 0 : i32
    %c0_i32_1 = arith.constant 0 : i32
    return %c0_i32, %c0_i32_0 : i32, i32
  }
  func.func @transform_3(%arg0: i32, %arg1: i32) -> (i32, i32) {
    %c0_i32 = arith.constant 0 : i32
    %c0_i32_0 = arith.constant 0 : i32
    %c0_i32_1 = arith.constant 0 : i32
    return %c0_i32, %c0_i32_0 : i32, i32
  }
  func.func @transform_4(%arg0: i32, %arg1: i32) -> (i32, i32, i32) {
    %c0_i32 = arith.constant 0 : i32
    %c0_i32_0 = arith.constant 0 : i32
    return %arg0, %c0_i32, %arg1 : i32, i32, i32
  }
}

</mosaic_0001>

<bundles_post_ra>
// kernel: tpu_custom_call.1
= control target key start
LH: loop header
LB: loop body
LE: loop exit
PB: predicated region body
PF: predicated region fallthrough
CT: control target
= control target key end

     0   :  { %9 = vsyncpa [#allocation3], 0  ;;  %s1330_s0 = inlined_call_operand.vmem [shape: f32[4,9,256], index: 0, kind: input, shape index: {}]   ;;  %s1331_s1 = inlined_call_operand.vmem [shape: f32[2,4,36,256], index: 1, kind: input, shape index: {}]   ;;  %s1332_s2 = inlined_call_operand.vmem [shape: bf16[8,36], index: 2, kind: input, shape index: {}]   ;;  %s1333_s3 = inlined_call_operand.vmem [shape: f32[8,1], index: 3, kind: input, shape index: {}]   ;;  %s1334_s4 = inlined_call_operand.hbm [shape: f32[2,8,256], index: 4, kind: output, shape index: {}]  }
   0x1   :  { %11 = vsyncpa [#allocation3 + $0x1], 0  ;;  %s928_s15 = smov 0   ;;  %s930_s16 = smov 0  }
   0x2   :  { %s932_s17 = smov 0   ;;  %s934_s18 = smov 0  }
   0x3   :  { %s936_s19 = smov 0   ;;  %s938_s20 = smov 0  }
   0x4 LB: > { %s706_s21 = sadd.s32 4294967295, %s900_s20   ;;  %s707_s22 = sadd.s32 4294967294, %s900_s20   ;;  %s900_s20 = sphi %s938_s20, %s17_s20   ;;  %s896_s19 = sphi %s936_s19, %s1341_s19   ;;  %s892_s18 = sphi %s934_s18, %s1340_s18   ;;  %s888_s17 = sphi %s932_s17, %s1339_s17   ;;  %s884_s16 = sphi %s930_s16, %s1338_s16   ;;  %s880_s15 = sphi %s928_s15, %s1337_s15  }
   0x5   : > { %s29_s23 = sadd.s32 1, %s896_s19  ;;  %s134_s24 = sadd.s32 1, %s888_s17 }
   0x6   : > { %p31_p0 = scmp.ge.s32.totalorder %s29_s23, 2  ;;  %p144_p1 = scmp.ne.s32.totalorder %s888_s17, %s884_s16 }
   0x7   : > { %p145_p2 = scmp.eq.s32.totalorder %s706_s21, 1  ;;  %p150_p3 = scmp.ne.s32.totalorder %s884_s16, %s880_s15 }
   0x8   : > { %s1343_s23 = smov (%p31_p0, %s29_s23), 0  ;;  %p151_p5 = scmp.eq.s32.totalorder %s707_s22, 1 }
   0x9   : > { %p968_p4 = por %p145_p2, %p144_p1  ;;  %s129_s26 = ssub.s32 %s896_s19, %s1343_s23 }
   0xa   : > { %p711_p6 = scmp.ge.s32.totalorder %s900_s20, 1  ;;  %p132_p7 = scmp.eq.s32.totalorder %s129_s26, 0 }
   0xb   : > { %p975_p8 = por %p151_p5, %p150_p3  ;;  %p197_p9 = scmp.lt.s32.totalorder %s900_s20, 3 }
   0xc   : > { %s981_s28 = scalar_select %p132_p7, %s888_s17, %s134_s24  }
   0xd   : > { %p198_p10 = pnand %p711_p6, %p197_p9 }
   0xe   : > { %p239_p11 = scmp.lt.s32.totalorder (!%p198_p10), %s892_s18, 1  ;;  %s229_s12 = sand.u32 (!%p198_p10), 1, %s884_s16  }
   0xf   : > { %201 = sbr.rel (%p198_p10) target bundleno = 209 (0xd1), region = 36  ;;  %s763_s14 = sshll.u32 (!%p198_p10), %s892_s18, 4 }
  0x10   : > { %s597_s5 = scalar_lea.sflag (!%p198_p10), [#allocation3], %s229_s12  ;;  %s842_s9 = scalar_lea.hbm (!%p198_p10), %s1334_s4, 32 }
  0x14   : > { %v987_v0 = vld [vmem:[%s1330_s0] sm:$0xff]  ;;  %v992_v1 = vld [vmem:[%s1330_s0 + $0x10] sm:$0x1]  ;;  %vm280_vm0 = vcmask 1042432   ;;  %s240_s13 = scalar_select %p239_p11, %s892_s18, 1  ;;  %vm269_vm1 = vcmask 1041408  }
  0x15   : > { %v281_v2 = vrot.slane %v987_v0, 5  ;;  %v283_v3 = vrot.slane %v992_v1, 5  ;;  %v999_v4 = vld [vmem:[%s1330_s0 + $0x20] sm:$0xff]  ;;  %v1004_v5 = vld [vmem:[%s1330_s0 + $0x30] sm:$0x1]  ;;  %v1034_v14 = vld [vmem:[%s1330_s0 + $0x8] sm:$0xff] }
  0x16   : > { %v1009_v6 = vld [vmem:[%s1330_s0 + $0x40] sm:$0xff]  ;;  %v346_v7 = vrot.slane %v999_v4, 5  ;;  %v348_v8 = vrot.slane %v1004_v5, 5  ;;  %v1017_v9 = vld [vmem:[%s1330_s0 + $0x50] sm:$0x1]  ;;  %vm258_vm2 = vcmask 1040384  }
  0x17   : > { %v422_v10 = vrot.slane %v1009_v6, 5  ;;  %v424_v11 = vrot.slane %v1017_v9, 5  ;;  %v1024_v12 = vld [vmem:[%s1330_s0 + $0x60] sm:$0xff]  ;;  %v1029_v13 = vld [vmem:[%s1330_s0 + $0x70] sm:$0x1]  ;;  %s764_s6 = smul.u32 320, %s240_s13  ;;  %v284_v15 = vsel %vm280_vm0, %v281_v2, %v283_v3 }
  0x18   : > { %v498_v16 = vrot.slane %v1024_v12, 5  ;;  %v500_v17 = vrot.slane %v1029_v13, 5  ;;  %v1044_v18 = vld [vmem:[%s1330_s0 + $0x18] sm:$0x1]  ;;  %v282_v19 = vrot.slane %v1034_v14, 5  ;;  %v349_v20 = vsel %vm280_vm0, %v346_v7, %v348_v8  ;;  %v1057_v23 = vld [vmem:[%s1330_s0 + $0x28] sm:$0xff] }
  0x19   : > { %v425_v21 = vsel %vm280_vm0, %v422_v10, %v424_v11  ;;  %v285_v22 = vrot.slane %v1044_v18, 5  ;;  %v1062_v24 = vld [vmem:[%s1330_s0 + $0x38] sm:$0x1]  ;;  %v1067_v25 = vld [vmem:[%s1330_s0 + $0x48] sm:$0xff]  ;;  %v259_v26 = vrot.slane %v987_v0, 7  ;;  %s1073_s24 = scalar_lea.vmem %s1331_s1, %s764_s6  ;;  %v347_v28 = vrot.slane %v1057_v23, 5 }
  0x1a   : > { %v501_v27 = vsel %vm280_vm0, %v498_v16, %v500_v17  ;;  %v350_v29 = vrot.slane %v1062_v24, 5  ;;  %v1083_v30 = vld [vmem:[%s1330_s0 + $0x58] sm:$0x1]  ;;  %v423_v31 = vrot.slane %v1067_v25, 5  ;;  %v1089_v32 = vld [vmem:[%s1330_s0 + $0x68] sm:$0xff]  ;;  %v261_v55 = vrot.slane %v992_v1, 7 }
  0x1b   : > { %v305_v33 = vld [vmem:[%s1073_s24 + $0x40] sm:$0xf]  ;;  %v726_v34 = vld [vmem:[%s1073_s24 + $0x90] sm:$0xf]  ;;  %v286_v36 = vsel %vm280_vm0, %v282_v19, %v285_v22  ;;  %v1099_v37 = vsel %vm258_vm2, %v992_v1, %v259_v26  ;;  %v306_v42 = vld [vmem:[%s1073_s24 + $0x48] sm:$0xf] }
  0x1c   : > { %v740_v35 = vld [vmem:[%s1073_s24 + $0xe0] sm:$0xf]  ;;  %v315_v38 = vmul.f32 %v305_v33, %v284_v15  ;;  %v381_v39 = vmul.f32 %v726_v34, %v349_v20  ;;  %v754_v41 = vld [vmem:[%s1073_s24 + $0x130] sm:$0xf]  ;;  %v351_v43 = vsel %vm280_vm0, %v347_v28, %v350_v29  ;;  %v727_v44 = vld [vmem:[%s1073_s24 + $0x98] sm:$0xf]  ;;  %v316_v46 = vmul.f32 %v306_v42, %v286_v36 }
  0x1d   : > { %v457_v40 = vmul.f32 %v740_v35, %v425_v21  ;;  %v533_v45 = vmul.f32 %v754_v41, %v501_v27  ;;  %v382_v47 = vmul.f32 %v727_v44, %v351_v43  ;;  %v426_v48 = vrot.slane %v1083_v30, 5  ;;  %v741_v49 = vld [vmem:[%s1073_s24 + $0xe8] sm:$0xf]  ;;  %v1112_v50 = vld [vmem:[%s1330_s0 + $0x78] sm:$0x1]  ;;  %v301_v60 = vld [vmem:[%s1073_s24 + $0x20] sm:$0xff] }
  0x1e   : > { %v391_v51 = vadd.f32 %v381_v39, %v315_v38  ;;  %v499_v52 = vrot.slane %v1089_v32, 5  ;;  %v502_v53 = vrot.slane %v1112_v50, 5  ;;  %v755_v54 = vld [vmem:[%s1073_s24 + $0x138] sm:$0xf]  ;;  %v270_v58 = vrot.slane %v987_v0, 6  ;;  %v303_v8 = vld [vmem:[%s1073_s24 + $0x30] sm:$0xff] }
  0x1f   : > { %v392_v56 = vadd.f32 %v382_v47, %v316_v46  ;;  %v427_v57 = vsel %vm280_vm0, %v423_v31, %v426_v48  ;;  %v272_v59 = vrot.slane %v992_v1, 6  ;;  %v262_v3 = vsel %vm258_vm2, %v259_v26, %v261_v55  ;;  %v722_v38 = vld [vmem:[%s1073_s24 + $0x70] sm:$0xff]  ;;  %v724_v39 = vld [vmem:[%s1073_s24 + $0x80] sm:$0xff]  ;;  %s712_s13 = sshll.u32 %s229_s12, 4 }
  0x20   : > { %v467_v61 = vadd.f32 %v457_v40, %v391_v51  ;;  %v458_v62 = vmul.f32 %v741_v49, %v427_v57  ;;  %v503_v63 = vsel %vm280_vm0, %v499_v52, %v502_v53  ;;  %v293_v17 = vsel %vm269_vm1, %v262_v3, %v270_v58  ;;  %v736_v49 = vld [vmem:[%s1073_s24 + $0xc0] sm:$0xff]  ;;  %v738_v51 = vld [vmem:[%s1073_s24 + $0xd0] sm:$0xff]  ;;  %s231_s26 = scalar_lea.vmem [#allocation2], %s712_s13 }
  0x21   : > { %v534_v11 = vmul.f32 %v755_v54, %v503_v63  ;;  %v273_v15 = vsel %vm269_vm1, %v270_v58, %v272_v59  ;;  %v326_v20 = vrot.slane %v999_v4, 7  ;;  %v311_v27 = vmul.f32 %v301_v60, %v293_v17  ;;  %s612_s29 = sshll.u32 %s231_s26, 4  ;;  %s613_s29 = int_to_ptr.vmem [resolvable:$true] %s612_s29 }
  0x22   : > { %v543_v1 = vadd.f32 %v533_v45, %v467_v61  ;;  %v468_v21 = vadd.f32 %v458_v62, %v392_v56  ;;  %v295_v22 = vsel %vm280_vm0, %v273_v15, %v281_v2  ;;  %v328_v26 = vrot.slane %v1004_v5, 7 }
  0x23   : > { %v313_v29 = vmul.f32 %v303_v8, %v295_v22  ;;  %v336_v33 = vrot.slane %v999_v4, 6  ;;  %v338_v34 = vrot.slane %v1004_v5, 6  ;;  %v402_v40 = vrot.slane %v1009_v6, 7 }
  0x24   : > { %v549_v35 = vpack.c.bf16 %v543_v1, %v543_v1  ;;  %v544_v36 = vadd.f32 %v534_v11, %v468_v21  ;;  %v404_v41 = vrot.slane %v1017_v9, 7  ;;  %v329_v2 = vsel %vm258_vm2, %v326_v20, %v328_v26  ;;  %v752_v21 = vld [vmem:[%s1073_s24 + $0x120] sm:$0xff] }
  0x25   : > { %v339_v42 = vsel %vm269_vm1, %v336_v33, %v338_v34  ;;  %v412_v43 = vrot.slane %v1009_v6, 6  ;;  %v414_v44 = vrot.slane %v1017_v9, 6  ;;  %v358_v47 = vsel %vm269_vm1, %v329_v2, %v336_v33  ;;  %v302_v34 = vld [vmem:[%s1073_s24 + $0x28] sm:$0xff] }
  0x26   : > { %v563_v45 = vsel %vm269_vm1, %v549_v35, 0  ;;  %v550_v46 = vpack.c.bf16 %v544_v36, %v544_v36  ;;  %v360_v48 = vsel %vm280_vm0, %v339_v42, %v346_v7  ;;  %v377_v53 = vmul.f32 %v722_v38, %v358_v47 }
  0x27   : > { %573 = vmatpush.bf16.msra.mxu0 %v563_v45  ;;  %v379_v54 = vmul.f32 %v724_v39, %v360_v48  ;;  %v405_v55 = vsel %vm258_vm2, %v402_v40, %v404_v41  ;;  %v415_v56 = vsel %vm269_vm1, %v412_v43, %v414_v44  ;;  %v478_v59 = vrot.slane %v1024_v12, 7  ;;  %v304_v41 = vld [vmem:[%s1073_s24 + $0x38] sm:$0xff] }
  0x28   : > { %v566_v57 = vsel %vm269_vm1, %v550_v46, 0  ;;  %v434_v58 = vsel %vm269_vm1, %v405_v55, %v412_v43  ;;  %v436_v7 = vsel %vm280_vm0, %v415_v56, %v422_v10  ;;  %v387_v60 = vadd.f32 %v377_v53, %v311_v27  ;;  %v750_v10 = vld [vmem:[%s1073_s24 + $0x110] sm:$0xff] }
  0x29   : > { %586 = vmatpush.bf16.msra.mxu1 %v566_v57  ;;  %v389_v61 = vadd.f32 %v379_v54, %v313_v29  ;;  %v453_v62 = vmul.f32 %v736_v49, %v434_v58  ;;  %v455_v63 = vmul.f32 %v738_v51, %v436_v7  ;;  %v480_v3 = vrot.slane %v1029_v13, 7  ;;  %v723_v49 = vld [vmem:[%s1073_s24 + $0x78] sm:$0xff]  ;;  %v725_v57 = vld [vmem:[%s1073_s24 + $0x88] sm:$0xff] }
  0x2a   : > { %v488_v8 = vrot.slane %v1024_v12, 6  ;;  %v490_v11 = vrot.slane %v1029_v13, 6  ;;  %v260_v15 = vrot.slane %v1034_v14, 7  ;;  %v263_v22 = vrot.slane %v1044_v18, 7 }
  0x2b   : > { %v463_v17 = vadd.f32 %v453_v62, %v387_v60  ;;  %v465_v1 = vadd.f32 %v455_v63, %v389_v61  ;;  %v271_v27 = vrot.slane %v1034_v14, 6  ;;  %v481_v29 = vsel %vm258_vm2, %v478_v59, %v480_v3  ;;  %v737_v3 = vld [vmem:[%s1073_s24 + $0xc8] sm:$0xff] }
  0x2c   : > { %v491_v26 = vsel %vm269_vm1, %v488_v8, %v490_v11  ;;  %v274_v33 = vrot.slane %v1044_v18, 6  ;;  %v327_v35 = vrot.slane %v1057_v23, 7  ;;  %v510_v36 = vsel %vm269_vm1, %v481_v29, %v488_v8 }
  0x2d   : > { %v512_v38 = vsel %vm280_vm0, %v491_v26, %v498_v16  ;;  %v264_v39 = vsel %vm258_vm2, %v260_v15, %v263_v22  ;;  %v330_v2 = vrot.slane %v1062_v24, 7  ;;  %v529_v42 = vmul.f32 %v750_v10, %v510_v36  ;;  %v299_v26 = vld [vmem:[%s1073_s24 + $0x10] sm:$0xff] }
  0x2e   : > { %v531_v43 = vmul.f32 %v752_v21, %v512_v38  ;;  %v275_v44 = vsel %vm269_vm1, %v271_v27, %v274_v33  ;;  %v294_v45 = vsel %vm269_vm1, %v264_v39, %v271_v27  ;;  %v337_v48 = vrot.slane %v1057_v23, 6  ;;  %v297_v21 = vld [vmem:[%s1073_s24] sm:$0xff]  ;;  %v751_v39 = vld [vmem:[%s1073_s24 + $0x118] sm:$0xff] }
  0x2f   : > { %v296_v46 = vsel %vm280_vm0, %v275_v44, %v282_v19  ;;  %v312_v47 = vmul.f32 %v302_v34, %v294_v45  ;;  %v331_v16 = vsel %vm258_vm2, %v327_v35, %v330_v2  ;;  %v539_v51 = vadd.f32 %v529_v42, %v463_v17  ;;  %v739_v17 = vld [vmem:[%s1073_s24 + $0xd8] sm:$0xff]  ;;  %v720_v45 = vld [vmem:[%s1073_s24 + $0x60] sm:$0xff] }
  0x30   : > { %v541_v53 = vadd.f32 %v531_v43, %v465_v1  ;;  %v314_v54 = vmul.f32 %v304_v41, %v296_v46  ;;  %v340_v55 = vrot.slane %v1062_v24, 6  ;;  %v359_v56 = vsel %vm269_vm1, %v331_v16, %v337_v48  ;;  %v718_v41 = vld [vmem:[%s1073_s24 + $0x50] sm:$0xff]  ;;  %v732_v46 = vld [vmem:[%s1073_s24 + $0xa0] sm:$0xff]  ;;  %v753_v16 = vld [vmem:[%s1073_s24 + $0x128] sm:$0xff] }
  0x31   : > { %v403_v19 = vrot.slane %v1067_v25, 7  ;;  %v406_v58 = vrot.slane %v1083_v30, 7  ;;  %v413_v7 = vrot.slane %v1067_v25, 6  ;;  %v378_v62 = vmul.f32 %v723_v49, %v359_v56  ;;  %v746_v56 = vld [vmem:[%s1073_s24 + $0xf0] sm:$0xff] }
  0x32   : > { %v547_v60 = vpack.c.bf16 %v541_v53, %v539_v51  ;;  %v341_v61 = vsel %vm269_vm1, %v337_v48, %v340_v55  ;;  %v416_v63 = vrot.slane %v1083_v30, 6  ;;  %v479_v1 = vrot.slane %v1089_v32, 7  ;;  %v734_v51 = vld [vmem:[%s1073_s24 + $0xb0] sm:$0xff] }
  0x33   : > { %v361_v8 = vsel %vm280_vm0, %v341_v61, %v347_v28  ;;  %v407_v11 = vsel %vm258_vm2, %v403_v19, %v406_v58  ;;  %v482_v10 = vrot.slane %v1112_v50, 7  ;;  %v388_v27 = vadd.f32 %v378_v62, %v312_v47  ;;  %v748_v58 = vld [vmem:[%s1073_s24 + $0x100] sm:$0xff] }
  0x34   : > { %574 = vmatpush.bf16.msra.mxu0 %v547_v60  ;;  %v380_v22 = vmul.f32 %v725_v57, %v361_v8  ;;  %v417_v29 = vsel %vm269_vm1, %v413_v7, %v416_v63  ;;  %v435_v28 = vsel %vm269_vm1, %v407_v11, %v413_v7  ;;  %v489_v38 = vrot.slane %v1089_v32, 6  ;;  %v298_v7 = vld [vmem:[%s1073_s24 + $0x8] sm:$0xff]  ;;  %v300_v63 = vld [vmem:[%s1073_s24 + $0x18] sm:$0xff] }
  0x35   : > { %v437_v33 = vsel %vm280_vm0, %v417_v29, %v423_v31  ;;  %v454_v34 = vmul.f32 %v737_v3, %v435_v28  ;;  %v483_v36 = vsel %vm258_vm2, %v479_v1, %v482_v10  ;;  %v492_v43 = vrot.slane %v1112_v50, 6  ;;  %v719_v3 = vld [vmem:[%s1073_s24 + $0x58] sm:$0xff] }
  0x36   : > { %v390_v2 = vadd.f32 %v380_v22, %v314_v54  ;;  %v456_v42 = vmul.f32 %v739_v17, %v437_v33  ;;  %v307_v44 = vmul.f32 %v297_v21, %v987_v0  ;;  %v511_v47 = vsel %vm269_vm1, %v483_v36, %v489_v38  ;;  %v733_v22 = vld [vmem:[%s1073_s24 + $0xa8] sm:$0xff] }
  0x37   : > { %v464_v31 = vadd.f32 %v454_v34, %v388_v27  ;;  %v309_v48 = vmul.f32 %v299_v26, %v1099_v37  ;;  %v356_v49 = vsel %vm258_vm2, %v1004_v5, %v326_v20  ;;  %v493_v0 = vsel %vm269_vm1, %v489_v38, %v492_v43  ;;  %v735_v27 = vld [vmem:[%s1073_s24 + $0xb8] sm:$0xff]  ;;  %v749_v33 = vld [vmem:[%s1073_s24 + $0x108] sm:$0xff] }
  0x38   : > { %v466_v53 = vadd.f32 %v456_v42, %v390_v2  ;;  %v530_v54 = vmul.f32 %v751_v39, %v511_v47  ;;  %v373_v55 = vmul.f32 %v718_v41, %v999_v4  ;;  %v513_v57 = vsel %vm280_vm0, %v493_v0, %v499_v52 }
  0x39   : > { %v375_v37 = vmul.f32 %v720_v45, %v356_v49  ;;  %v432_v5 = vsel %vm258_vm2, %v1017_v9, %v402_v40  ;;  %v449_v20 = vmul.f32 %v732_v46, %v1009_v6  ;;  %v532_v60 = vmul.f32 %v753_v16, %v513_v57  ;;  %v721_v40 = vld [vmem:[%s1073_s24 + $0x68] sm:$0xff] }
  0x3a   : > { %v540_v4 = vadd.f32 %v530_v54, %v464_v31  ;;  %v383_v61 = vadd.f32 %v373_v55, %v307_v44  ;;  %v451_v62 = vmul.f32 %v734_v51, %v432_v5  ;;  %v508_v8 = vsel %vm258_vm2, %v1029_v13, %v478_v59  ;;  %v747_v59 = vld [vmem:[%s1073_s24 + $0xf8] sm:$0xff]  ;;  %s610_s24 = scalar_lea.hbm %s1334_s4, %s763_s14 }
  0x3b   : > { %v385_v52 = vadd.f32 %v375_v37, %v309_v48  ;;  %v525_v9 = vmul.f32 %v746_v56, %v1024_v12  ;;  %v292_v6 = vsel %vm258_vm2, %v1044_v18, %v260_v15  ;;  %v542_v11 = vadd.f32 %v532_v60, %v466_v53  ;;  %s614_s30 = sshll.u32 %s610_s24, 4  ;;  %s615_s30 = int_to_ptr.hbm [resolvable:$true] %s614_s30 }
  0x3c   : > { %v459_v17 = vadd.f32 %v449_v20, %v383_v61  ;;  %v527_v10 = vmul.f32 %v748_v58, %v508_v8  ;;  %v308_v21 = vmul.f32 %v298_v7, %v1034_v14  ;;  %v310_v28 = vmul.f32 %v300_v63, %v292_v6  ;;  %s836_s18 = sshra.s32 %s615_s30, 4  ;;  %s837_s18 = int_to_ptr.hbm [resolvable:$true] %s836_s18 }
  0x3d   : > { %v461_v29 = vadd.f32 %v451_v62, %v385_v52  ;;  %v357_v12 = vsel %vm258_vm2, %v1062_v24, %v327_v35  ;;  %v374_v13 = vmul.f32 %v719_v3, %v1057_v23  ;;  %v548_v18 = vpack.c.bf16 %v542_v11, %v540_v4  ;;  %v552_v35 = vld [vmem:[%s1333_s3] sm:$0xff]  ;;  %s838_s6 = scalar_lea.hbm %s837_s18, 16  ;;  %p843_p1 = scmp.lt.s32.totalorder %s837_s18, %s1334_s4 }
  0x3e   : > { %v535_v15 = vadd.f32 %v525_v9, %v459_v17  ;;  %v376_v26 = vmul.f32 %v721_v40, %v357_v12  ;;  %v433_v14 = vsel %vm258_vm2, %v1083_v30, %v403_v19  ;;  %v450_v38 = vmul.f32 %v733_v22, %v1067_v25  ;;  %p839_p12 = scmp.ne.s32.totalorder %s837_s18, %s838_s6  ;;  %p844_p2 = scmp.lt.s32.totalorder %s842_s9, %s838_s6 }
  0x3f   : > { %v537_v34 = vadd.f32 %v527_v10, %v461_v29  ;;  %v384_v36 = vadd.f32 %v374_v13, %v308_v21  ;;  %v452_v39 = vmul.f32 %v735_v27, %v433_v14  ;;  %587 = vmatpush.bf16.msra.mxu1 %v548_v18  ;;  %v509_v23 = vsel %vm258_vm2, %v1112_v50, %v479_v1  ;;  %v551_v50 = vld [vmem:[%s1332_s2] sm:$0xf] }
  0x40   : > { %v386_v41 = vadd.f32 %v376_v26, %v310_v28  ;;  %v526_v24 = vmul.f32 %v747_v59, %v1089_v32  ;;  %v528_v2 = vmul.f32 %v749_v33, %v509_v23  ;;  %v902_v42 = vmov 0   ;;  %p840_p13 = pnand %p839_p12, %p968_p4  ;;  %p845_p3 = por %p844_p2, %p843_p1 }
  0x41   : > { %v545_v30 = vpack.c.bf16 %v537_v34, %v535_v15  ;;  %v460_v19 = vadd.f32 %v450_v38, %v384_v36  ;;  %821 = vset.pattern.permute.xlu0 %v902_v42  ;;  %vm558_vm3 = vcmask 293888  }
  0x42   : > { %v462_v25 = vadd.f32 %v452_v39, %v386_v41  ;;  %555 = vperm.xlu0 %821, %v552_v35   ;;  %p841_p0 = pneg %p840_p13 }
  0x43   : > { %575 = vmatpush.bf16.msra.mxu0 %v545_v30  ;;  %v536_v43 = vadd.f32 %v526_v24, %v460_v19 }
  0x44   : > { %v538_v32 = vadd.f32 %v528_v2, %v462_v25  ;;  %p846_p5 = pnand %p845_p3, %p841_p0 }
  0x46   : > { %v546_v1 = vpack.c.bf16 %v538_v32, %v536_v43  ;;  %756 = vmatmul.msk.bf16.vlgmr.msra.gmra.mxu0 %vm558_vm3, %v551_v50 }
  0x48   : > { %588 = vmatpush.bf16.msra.mxu1 %v546_v1 }
  0x4b   : > { %757 = vmatmul.msk.bf16.vlgmr.msra.gmra.mxu1 %vm558_vm3, %v551_v50 }
  0xb4   : > { %v556_v44 = vpop.permute.xlu0 %555 }
  0xc3   : > { %v577_v45 = vpop.f32.mrf.mxu0 }
  0xc4   : > { %v578_v46 = vadd.f32 %v577_v45, %v556_v44 }
  0xc6   : > { %594 = vst [vmem:[%s231_s26] sm:$0xff] %v578_v46 }
  0xc8   : > { %v590_v31 = vpop.f32.mrf.mxu1 }
  0xc9   : > { %v591_v47 = vadd.f32 %v590_v31, %v556_v44 }
  0xcb   : > { %595 = vst [vmem:[%s231_s26 + $0x8] sm:$0xff] %v591_v47  ;;  %v579_v16 = vpop.f32.mrf.mxu0 }
  0xcc   : > { %849 = shalt.err (!%p846_p5)
}
  0xcd   : > { %765 = dma.vmem_to_hbm [thread:$0]  (%p968_p4), %s613_s29, 256, %s615_s30, %s597_s5  }
  0xd0   : > { %v592_v48 = vpop.f32.mrf.mxu1 }
  0xd1 PF: > { %p771_p6 = scmp.ge.s32.totalorder %s900_s20, 2  ;;  %s626_s12 = sand.u32 1, %s880_s15  }
  0xd2   : > { %s627_s13 = scalar_lea.sflag [#allocation3], %s626_s12 }
  0xd3   : > { %p768_p7 = pnand %p771_p6, %p975_p8 }
  0xd5   : > { %p769_p9 = pneg %p768_p7 }
  0xd7   : > { %875 = dma.done.wait (%p769_p9), %s627_s13, 256  }
  0xd8   : > { %877 = vsyncadd (%p769_p9), %s627_s13, 4294967040  ;;  %s17_s20 = sadd.s32 1, %s900_s20   ;;  %s1337_s15 = smov %s884_s16 }
  0xd9   : > { %p14_p10 = scmp.ge.s32.totalorder %s17_s20, 4   ;;  %s1338_s16 = smov %s888_s17 }
  0xda   : > { %s1339_s17 = smov %s981_s28  ;;  %s1340_s18 = smov %s896_s19 }
  0xdb   : > { %s1341_s19 = smov %s1343_s23  ;;  %16 = sbr.rel (!%p14_p10) target bundleno = 4 (0x4), region = 80 }
  0xe0   :  { %633 = vsyncpa [#allocation3], 1 }
  0xe1   :  { %635 = vsyncpa [#allocation3 + $0x1], 1 }

</bundles_post_ra>
